<compile_context>
chip_gen: v6e
topology: v6e:2x2x1
jax: 0.10.0
libtpu: 0.0.40
codegen_flags: <defaults>
</compile_context>

<pallas_src>
import functools

import jax
import jax.numpy as jnp
from jax.experimental import pallas as pl
from jax.experimental.pallas import tpu as pltpu


def _round_up(v, m):
    return ((v + m - 1) // m) * m


def _cdiv(a, b):
    return -(-a // b)


def _prodnet_dims(in_N):
    if in_N % 2 == 0:
        return 6 * in_N, in_N // 2
    return 6 * (in_N - 1) + 2, in_N // 2 + 1


def _choose_batch_tile(N, tn):
    """16-aligned batch tile (bf16 sublane packing) sized so the last tile is
    not mostly padding; when the batch is big enough, force >= 2 grid steps so
    both v7x TensorCores get work under dimension_semantics=('parallel',)."""
    tn = max(16, tn)
    n_tiles = _cdiv(N, tn)
    if n_tiles == 1 and N > 16:
        n_tiles = 2
    tn_eff = _round_up(_cdiv(N, n_tiles), 16)
    N_pad = _round_up(N, tn_eff)
    return tn_eff, N_pad


def _make_kernel(num_layers):
    """Kernel arg list: (x, w0, b0, w1, b1, ..., out). All tiles in VMEM."""

    def kernel(*refs):
        x_ref, out_ref = refs[0], refs[-1]
        compute_dtype = refs[1].dtype
        h = x_ref[...]                                   # (TN, in_pad)
        for i in range(num_layers):
            w = refs[1 + 2 * i][...]                     # (d_in_pad, d_out_pad)
            bias = refs[2 + 2 * i][...]                  # (1, d_out_pad), f32
            acc = jnp.dot(h, w, preferred_element_type=jnp.float32) + bias
            if i < num_layers - 1:                       # clamp(min=0) == ReLU
                h = jnp.maximum(acc, 0.0).astype(compute_dtype)
            else:
                h = acc                                  # last layer: no ReLU
        out_ref[...] = h.astype(out_ref.dtype)

    return kernel


def prepare_prodnet_params(weights, biases, compute_dtype=jnp.bfloat16):
    """Hoisted out of the forward path (done once): pad feature dims to
    multiples of 128 (lane-dense MXU tiles) and cast weights to the compute
    dtype.  Zero padding keeps padded lanes exactly 0 through matmul + bias +
    ReLU.  Use compute_dtype=jnp.float32 to recover exact f32 semantics."""
    weights_p, biases_p = [], []
    for w, b in zip(weights, biases):
        d_in, d_out = w.shape
        d_in_p = _round_up(d_in, 128)
        d_out_p = _round_up(d_out, 128)
        weights_p.append(
            jnp.pad(w, ((0, d_in_p - d_in), (0, d_out_p - d_out))).astype(compute_dtype))
        biases_p.append(
            jnp.pad(b, ((0, 0), (0, d_out_p - d_out))).astype(jnp.float32))
    return weights_p, biases_p


@functools.partial(
    jax.jit,
    static_argnames=("out_N", "tn", "out_dtype", "single_buffer_weights"))
def prodnet_forward(x, weights_p, biases_p, *, out_N, tn=512,
                    out_dtype=jnp.float32, single_buffer_weights=True):
    """x: (N, in_N) f32; weights_p/biases_p: padded params from
    prepare_prodnet_params.  Returns (N, out_N) out_dtype, matching
    ProdNet.forward (up to the bf16 MXU precision of the padded weights)."""
    N, in_N = x.shape
    num_layers = len(weights_p)
    compute_dtype = weights_p[0].dtype
    in_pad = weights_p[0].shape[0]
    out_pad = weights_p[-1].shape[1]
    assert in_pad >= in_N

    tn_eff, N_pad = _choose_batch_tile(N, tn)

    # Zero-pad x on batch rows and feature lanes; cast to the compute dtype.
    x_p = jnp.pad(x.astype(compute_dtype),
                  ((0, N_pad - N), (0, in_pad - in_N)))

    # Weights/biases: constant index_map -> fetched once, VMEM-resident across
    # all batch tiles; single-buffered since they never change.
    w_mode = pl.Buffered(1) if single_buffer_weights else None

    def wspec(shape):
        if w_mode is None:
            return pl.BlockSpec(shape, lambda i: (0, 0))
        return pl.BlockSpec(shape, lambda i: (0, 0), pipeline_mode=w_mode)

    in_specs = [pl.BlockSpec((tn_eff, in_pad), lambda i: (i, 0))]
    params = []
    flops = 0
    c_bytes = jnp.dtype(compute_dtype).itemsize
    o_bytes = jnp.dtype(out_dtype).itemsize
    bytes_accessed = N_pad * in_pad * c_bytes + N_pad * out_pad * o_bytes
    weight_vmem = 0
    max_feat = in_pad
    for w_p, b_p in zip(weights_p, biases_p):
        d_in_p, d_out_p = w_p.shape
        params += [w_p, b_p]
        in_specs.append(wspec((d_in_p, d_out_p)))
        in_specs.append(wspec((1, d_out_p)))
        flops += 2 * N_pad * d_in_p * d_out_p
        bytes_accessed += w_p.size * c_bytes + b_p.size * 4
        nbuf = 1 if single_buffer_weights else 2
        weight_vmem += nbuf * (w_p.size * c_bytes + b_p.size * 4)
        max_feat = max(max_feat, d_out_p)

    # Explicit VMEM budget: resident weights (single-buffered) + double-
    # buffered x/out tiles + f32 activations for the widest layer pair, with
    # ~50% headroom; capped to stay inside v7x's 64 MiB/TC.
    act_vmem = 2 * tn_eff * max_feat * 4
    io_vmem = 2 * tn_eff * in_pad * c_bytes + 2 * tn_eff * out_pad * o_bytes
    vmem_limit = int(1.5 * (weight_vmem + act_vmem + io_vmem)) + (2 << 20)
    vmem_limit = max(8 << 20, min(vmem_limit, 56 << 20))
    # TODO(synk): once resident bf16 weights exceed ~48-56 MiB (v7x 64 MiB/TC
    # residency wall), switch the hidden-layer matmuls to K-streamed weights
    # via pltpu.emit_pipeline over a K axis with an f32 VMEM accumulator.

    kernel = _make_kernel(num_layers)
    out_p = pl.pallas_call(
        kernel,
        out_shape=jax.ShapeDtypeStruct((N_pad, out_pad), out_dtype),
        grid=(N_pad // tn_eff,),
        in_specs=in_specs,
        out_specs=pl.BlockSpec((tn_eff, out_pad), lambda i: (i, 0)),
        compiler_params=pltpu.CompilerParams(
            dimension_semantics=("parallel",),
            vmem_limit_bytes=vmem_limit),
        cost_estimate=pl.CostEstimate(
            flops=flops, transcendentals=0, bytes_accessed=bytes_accessed),
    )(x_p, *params)

    if N_pad == N and out_pad == out_N:
        return out_p                       # already lane-/row-exact: no copy
    return out_p[:N, :out_N]


def init_prodnet_params(key, in_N, num_L, a, b):
    """Xavier-uniform weights, uniform[a,b] biases — mirrors ProdNet.xavier_init.
    Weights are stored transposed vs. PyTorch (in_features, out_features) so
    the kernel computes h @ W + b directly on the MXU."""
    mid_N, out_N = _prodnet_dims(in_N)
    dims = [in_N] + [mid_N] * num_L + [out_N]
    weights, biases = [], []
    for i in range(num_L + 1):
        d_in, d_out = dims[i], dims[i + 1]
        key, wk, bk = jax.random.split(key, 3)
        limit = jnp.sqrt(6.0 / (d_in + d_out))
        weights.append(jax.random.uniform(wk, (d_in, d_out), jnp.float32, -limit, limit))
        biases.append(jax.random.uniform(bk, (1, d_out), jnp.float32, a, b))
    return weights, biases


def prodnet_reference(x, weights, biases, compute_dtype=jnp.float32):
    """Pure-JAX reference with the same dtype policy as the kernel."""
    h = x.astype(compute_dtype)
    for i, (w, b) in enumerate(zip(weights, biases)):
        h = (jnp.dot(h, w.astype(compute_dtype),
                     preferred_element_type=jnp.float32)
             + b.astype(jnp.float32))
        if i < len(weights) - 1:
            h = jnp.maximum(h, 0.0).astype(compute_dtype)
    return h


if __name__ == "__main__":
    # Small shapes consistent with the module: N samples, in_N features.
    in_N = 4          # even branch: mid_N = 24, out_N = 2
    num_L = 3
    a, b = -1.0, 1.0
    N = 8

    key = jax.random.PRNGKey(0)
    key, xk = jax.random.split(key)
    x = jax.random.uniform(xk, (N, in_N), jnp.float32, a, b)

    weights, biases = init_prodnet_params(key, in_N, num_L, a, b)
    _, out_N = _prodnet_dims(in_N)

    # One-time: pad to 128-lane tiles and cast to bf16 (hoisted out of forward).
    weights_p, biases_p = prepare_prodnet_params(weights, biases, jnp.bfloat16)

    try:
        out = jax.block_until_ready(
            prodnet_forward(x, weights_p, biases_p, out_N=out_N))
    except Exception:
        # Fallback if this JAX build rejects single-buffered BlockSpecs.
        out = jax.block_until_ready(
            prodnet_forward(x, weights_p, biases_p, out_N=out_N,
                            single_buffer_weights=False))
    assert out.shape == (N, out_N), out.shape

    # Same-arithmetic (bf16 matmul inputs, f32 accumulation) reference.
    ref_bf16 = prodnet_reference(x, weights, biases, compute_dtype=jnp.bfloat16)
    assert jnp.allclose(out, ref_bf16, atol=1e-3, rtol=1e-3), \
        "mismatch vs bf16 reference"

    # Full-f32 module semantics — bf16 MXU error is small at these widths.
    ref_f32 = prodnet_reference(x, weights, biases, compute_dtype=jnp.float32)
    assert jnp.max(jnp.abs(out - ref_f32)) < 5e-2, "mismatch vs f32 reference"

    print("KERNEL_OK")
</pallas_src>

<mosaic_0001>
module attributes {stable_mosaic.version = 11 : i64} {
  func.func @kernel(%arg0: i32, %arg1: memref<16x128xbf16, #tpu.memory_space<vmem>>, %arg2: memref<128x128xbf16, #tpu.memory_space<vmem>>, %arg3: memref<1x128xf32, #tpu.memory_space<vmem>>, %arg4: memref<128x128xbf16, #tpu.memory_space<vmem>>, %arg5: memref<1x128xf32, #tpu.memory_space<vmem>>, %arg6: memref<128x128xbf16, #tpu.memory_space<vmem>>, %arg7: memref<1x128xf32, #tpu.memory_space<vmem>>, %arg8: memref<128x128xbf16, #tpu.memory_space<vmem>>, %arg9: memref<1x128xf32, #tpu.memory_space<vmem>>, %arg10: memref<16x128xf32, #tpu.memory_space<vmem>>) attributes {dimension_semantics = [#tpu.dimension_semantics<parallel>], iteration_bounds = array<i64: 1>, scalar_prefetch = 0 : i64, scratch_operands = 0 : i64, tpu.core_type = #tpu.core_type<tc>, window_params = [{transform_indices = @transform_0, window_bounds = array<i64: 16, 128>}, {pipeline_mode = #tpu.pipeline_mode<synchronous>, transform_indices = @transform_1, window_bounds = array<i64: 128, 128>}, {pipeline_mode = #tpu.pipeline_mode<synchronous>, transform_indices = @transform_2, window_bounds = array<i64: 1, 128>}, {pipeline_mode = #tpu.pipeline_mode<synchronous>, transform_indices = @transform_3, window_bounds = array<i64: 128, 128>}, {pipeline_mode = #tpu.pipeline_mode<synchronous>, transform_indices = @transform_4, window_bounds = array<i64: 1, 128>}, {pipeline_mode = #tpu.pipeline_mode<synchronous>, transform_indices = @transform_5, window_bounds = array<i64: 128, 128>}, {pipeline_mode = #tpu.pipeline_mode<synchronous>, transform_indices = @transform_6, window_bounds = array<i64: 1, 128>}, {pipeline_mode = #tpu.pipeline_mode<synchronous>, transform_indices = @transform_7, window_bounds = array<i64: 128, 128>}, {pipeline_mode = #tpu.pipeline_mode<synchronous>, transform_indices = @transform_8, window_bounds = array<i64: 1, 128>}, {transform_indices = @transform_9, window_bounds = array<i64: 16, 128>}]} {
    %c0 = arith.constant 0 : index
    %c0_0 = arith.constant 0 : index
    %0 = vector.load %arg1[%c0, %c0_0] : memref<16x128xbf16, #tpu.memory_space<vmem>>, vector<16x128xbf16>
    %c0_1 = arith.constant 0 : index
    %c0_2 = arith.constant 0 : index
    %1 = vector.load %arg2[%c0_1, %c0_2] : memref<128x128xbf16, #tpu.memory_space<vmem>>, vector<128x128xbf16>
    %c0_3 = arith.constant 0 : index
    %c0_4 = arith.constant 0 : index
    %2 = vector.load %arg3[%c0_3, %c0_4] : memref<1x128xf32, #tpu.memory_space<vmem>>, vector<1x128xf32>
    %cst = arith.constant dense<0.000000e+00> : vector<16x128xf32>
    %3 = tpu.matmul %0, %1, %cst {dimension_numbers = #tpu.dot_dimension_numbers<[1], [0], [0], [1], [0, 0, 1, 1], [], []>} : vector<16x128xbf16>, vector<128x128xbf16>, vector<16x128xf32> -> vector<16x128xf32>
    %4 = vector.broadcast %2 : vector<1x128xf32> to vector<16x128xf32>
    %5 = arith.addf %3, %4 : vector<16x128xf32>
    %cst_5 = arith.constant 0.000000e+00 : f32
    %6 = vector.broadcast %cst_5 : f32 to vector<16x128xf32>
    %7 = arith.maximumf %5, %6 : vector<16x128xf32>
    %8 = arith.truncf %7 : vector<16x128xf32> to vector<16x128xbf16>
    %c0_6 = arith.constant 0 : index
    %c0_7 = arith.constant 0 : index
    %9 = vector.load %arg4[%c0_6, %c0_7] : memref<128x128xbf16, #tpu.memory_space<vmem>>, vector<128x128xbf16>
    %c0_8 = arith.constant 0 : index
    %c0_9 = arith.constant 0 : index
    %10 = vector.load %arg5[%c0_8, %c0_9] : memref<1x128xf32, #tpu.memory_space<vmem>>, vector<1x128xf32>
    %cst_10 = arith.constant dense<0.000000e+00> : vector<16x128xf32>
    %11 = tpu.matmul %8, %9, %cst_10 {dimension_numbers = #tpu.dot_dimension_numbers<[1], [0], [0], [1], [0, 0, 1, 1], [], []>} : vector<16x128xbf16>, vector<128x128xbf16>, vector<16x128xf32> -> vector<16x128xf32>
    %12 = vector.broadcast %10 : vector<1x128xf32> to vector<16x128xf32>
    %13 = arith.addf %11, %12 : vector<16x128xf32>
    %cst_11 = arith.constant 0.000000e+00 : f32
    %14 = vector.broadcast %cst_11 : f32 to vector<16x128xf32>
    %15 = arith.maximumf %13, %14 : vector<16x128xf32>
    %16 = arith.truncf %15 : vector<16x128xf32> to vector<16x128xbf16>
    %c0_12 = arith.constant 0 : index
    %c0_13 = arith.constant 0 : index
    %17 = vector.load %arg6[%c0_12, %c0_13] : memref<128x128xbf16, #tpu.memory_space<vmem>>, vector<128x128xbf16>
    %c0_14 = arith.constant 0 : index
    %c0_15 = arith.constant 0 : index
    %18 = vector.load %arg7[%c0_14, %c0_15] : memref<1x128xf32, #tpu.memory_space<vmem>>, vector<1x128xf32>
    %cst_16 = arith.constant dense<0.000000e+00> : vector<16x128xf32>
    %19 = tpu.matmul %16, %17, %cst_16 {dimension_numbers = #tpu.dot_dimension_numbers<[1], [0], [0], [1], [0, 0, 1, 1], [], []>} : vector<16x128xbf16>, vector<128x128xbf16>, vector<16x128xf32> -> vector<16x128xf32>
    %20 = vector.broadcast %18 : vector<1x128xf32> to vector<16x128xf32>
    %21 = arith.addf %19, %20 : vector<16x128xf32>
    %cst_17 = arith.constant 0.000000e+00 : f32
    %22 = vector.broadcast %cst_17 : f32 to vector<16x128xf32>
    %23 = arith.maximumf %21, %22 : vector<16x128xf32>
    %24 = arith.truncf %23 : vector<16x128xf32> to vector<16x128xbf16>
    %c0_18 = arith.constant 0 : index
    %c0_19 = arith.constant 0 : index
    %25 = vector.load %arg8[%c0_18, %c0_19] : memref<128x128xbf16, #tpu.memory_space<vmem>>, vector<128x128xbf16>
    %c0_20 = arith.constant 0 : index
    %c0_21 = arith.constant 0 : index
    %26 = vector.load %arg9[%c0_20, %c0_21] : memref<1x128xf32, #tpu.memory_space<vmem>>, vector<1x128xf32>
    %cst_22 = arith.constant dense<0.000000e+00> : vector<16x128xf32>
    %27 = tpu.matmul %24, %25, %cst_22 {dimension_numbers = #tpu.dot_dimension_numbers<[1], [0], [0], [1], [0, 0, 1, 1], [], []>} : vector<16x128xbf16>, vector<128x128xbf16>, vector<16x128xf32> -> vector<16x128xf32>
    %28 = vector.broadcast %26 : vector<1x128xf32> to vector<16x128xf32>
    %29 = arith.addf %27, %28 : vector<16x128xf32>
    %c0_23 = arith.constant 0 : index
    %c0_24 = arith.constant 0 : index
    %30 = vector.load %arg10[%c0_23, %c0_24] : memref<16x128xf32, #tpu.memory_space<vmem>>, vector<16x128xf32>
    tpu.vector_store %arg10[%c0_23, %c0_24], %29 {strides = array<i32>} : memref<16x128xf32, #tpu.memory_space<vmem>>, vector<16x128xf32>,
    return
  }
  func.func @transform_0(%arg0: i32) -> (i32, i32) {
    %c0_i32 = arith.constant 0 : i32
    %c0_i32_0 = arith.constant 0 : i32
    return %arg0, %c0_i32 : i32, i32
  }
  func.func @transform_1(%arg0: i32) -> (i32, i32) {
    %c0_i32 = arith.constant 0 : i32
    %c0_i32_0 = arith.constant 0 : i32
    %c0_i32_1 = arith.constant 0 : i32
    return %c0_i32, %c0_i32_0 : i32, i32
  }
  func.func @transform_2(%arg0: i32) -> (i32, i32) {
    %c0_i32 = arith.constant 0 : i32
    %c0_i32_0 = arith.constant 0 : i32
    %c0_i32_1 = arith.constant 0 : i32
    return %c0_i32, %c0_i32_0 : i32, i32
  }
  func.func @transform_3(%arg0: i32) -> (i32, i32) {
    %c0_i32 = arith.constant 0 : i32
    %c0_i32_0 = arith.constant 0 : i32
    %c0_i32_1 = arith.constant 0 : i32
    return %c0_i32, %c0_i32_0 : i32, i32
  }
  func.func @transform_4(%arg0: i32) -> (i32, i32) {
    %c0_i32 = arith.constant 0 : i32
    %c0_i32_0 = arith.constant 0 : i32
    %c0_i32_1 = arith.constant 0 : i32
    return %c0_i32, %c0_i32_0 : i32, i32
  }
  func.func @transform_5(%arg0: i32) -> (i32, i32) {
    %c0_i32 = arith.constant 0 : i32
    %c0_i32_0 = arith.constant 0 : i32
    %c0_i32_1 = arith.constant 0 : i32
    return %c0_i32, %c0_i32_0 : i32, i32
  }
  func.func @transform_6(%arg0: i32) -> (i32, i32) {
    %c0_i32 = arith.constant 0 : i32
    %c0_i32_0 = arith.constant 0 : i32
    %c0_i32_1 = arith.constant 0 : i32
    return %c0_i32, %c0_i32_0 : i32, i32
  }
  func.func @transform_7(%arg0: i32) -> (i32, i32) {
    %c0_i32 = arith.constant 0 : i32
    %c0_i32_0 = arith.constant 0 : i32
    %c0_i32_1 = arith.constant 0 : i32
    return %c0_i32, %c0_i32_0 : i32, i32
  }
  func.func @transform_8(%arg0: i32) -> (i32, i32) {
    %c0_i32 = arith.constant 0 : i32
    %c0_i32_0 = arith.constant 0 : i32
    %c0_i32_1 = arith.constant 0 : i32
    return %c0_i32, %c0_i32_0 : i32, i32
  }
  func.func @transform_9(%arg0: i32) -> (i32, i32) {
    %c0_i32 = arith.constant 0 : i32
    %c0_i32_0 = arith.constant 0 : i32
    return %arg0, %c0_i32 : i32, i32
  }
}

module attributes {stable_mosaic.version = 11 : i64} {
  func.func @kernel(%arg0: i32, %arg1: memref<16x128xbf16, #tpu.memory_space<vmem>>, %arg2: memref<128x128xbf16, #tpu.memory_space<vmem>>, %arg3: memref<1x128xf32, #tpu.memory_space<vmem>>, %arg4: memref<128x128xbf16, #tpu.memory_space<vmem>>, %arg5: memref<1x128xf32, #tpu.memory_space<vmem>>, %arg6: memref<128x128xbf16, #tpu.memory_space<vmem>>, %arg7: memref<1x128xf32, #tpu.memory_space<vmem>>, %arg8: memref<128x128xbf16, #tpu.memory_space<vmem>>, %arg9: memref<1x128xf32, #tpu.memory_space<vmem>>, %arg10: memref<16x128xf32, #tpu.memory_space<vmem>>) attributes {dimension_semantics = [#tpu.dimension_semantics<parallel>], iteration_bounds = array<i64: 1>, scalar_prefetch = 0 : i64, scratch_operands = 0 : i64, tpu.core_type = #tpu.core_type<tc>, window_params = [{transform_indices = @transform_0, window_bounds = array<i64: 16, 128>}, {pipeline_mode = #tpu.pipeline_mode<synchronous>, transform_indices = @transform_1, window_bounds = array<i64: 128, 128>}, {pipeline_mode = #tpu.pipeline_mode<synchronous>, transform_indices = @transform_2, window_bounds = array<i64: 1, 128>}, {pipeline_mode = #tpu.pipeline_mode<synchronous>, transform_indices = @transform_3, window_bounds = array<i64: 128, 128>}, {pipeline_mode = #tpu.pipeline_mode<synchronous>, transform_indices = @transform_4, window_bounds = array<i64: 1, 128>}, {pipeline_mode = #tpu.pipeline_mode<synchronous>, transform_indices = @transform_5, window_bounds = array<i64: 128, 128>}, {pipeline_mode = #tpu.pipeline_mode<synchronous>, transform_indices = @transform_6, window_bounds = array<i64: 1, 128>}, {pipeline_mode = #tpu.pipeline_mode<synchronous>, transform_indices = @transform_7, window_bounds = array<i64: 128, 128>}, {pipeline_mode = #tpu.pipeline_mode<synchronous>, transform_indices = @transform_8, window_bounds = array<i64: 1, 128>}, {transform_indices = @transform_9, window_bounds = array<i64: 16, 128>}]} {
    %c0 = arith.constant 0 : index
    %c0_0 = arith.constant 0 : index
    %0 = vector.load %arg1[%c0, %c0_0] : memref<16x128xbf16, #tpu.memory_space<vmem>>, vector<16x128xbf16>
    %c0_1 = arith.constant 0 : index
    %c0_2 = arith.constant 0 : index
    %1 = vector.load %arg2[%c0_1, %c0_2] : memref<128x128xbf16, #tpu.memory_space<vmem>>, vector<128x128xbf16>
    %c0_3 = arith.constant 0 : index
    %c0_4 = arith.constant 0 : index
    %2 = vector.load %arg3[%c0_3, %c0_4] : memref<1x128xf32, #tpu.memory_space<vmem>>, vector<1x128xf32>
    %cst = arith.constant dense<0.000000e+00> : vector<16x128xf32>
    %3 = tpu.matmul %0, %1, %cst {dimension_numbers = #tpu.dot_dimension_numbers<[1], [0], [0], [1], [0, 0, 1, 1], [], []>} : vector<16x128xbf16>, vector<128x128xbf16>, vector<16x128xf32> -> vector<16x128xf32>
    %4 = vector.broadcast %2 : vector<1x128xf32> to vector<16x128xf32>
    %5 = arith.addf %3, %4 : vector<16x128xf32>
    %cst_5 = arith.constant 0.000000e+00 : f32
    %6 = vector.broadcast %cst_5 : f32 to vector<16x128xf32>
    %7 = arith.maximumf %5, %6 : vector<16x128xf32>
    %8 = arith.truncf %7 : vector<16x128xf32> to vector<16x128xbf16>
    %c0_6 = arith.constant 0 : index
    %c0_7 = arith.constant 0 : index
    %9 = vector.load %arg4[%c0_6, %c0_7] : memref<128x128xbf16, #tpu.memory_space<vmem>>, vector<128x128xbf16>
    %c0_8 = arith.constant 0 : index
    %c0_9 = arith.constant 0 : index
    %10 = vector.load %arg5[%c0_8, %c0_9] : memref<1x128xf32, #tpu.memory_space<vmem>>, vector<1x128xf32>
    %cst_10 = arith.constant dense<0.000000e+00> : vector<16x128xf32>
    %11 = tpu.matmul %8, %9, %cst_10 {dimension_numbers = #tpu.dot_dimension_numbers<[1], [0], [0], [1], [0, 0, 1, 1], [], []>} : vector<16x128xbf16>, vector<128x128xbf16>, vector<16x128xf32> -> vector<16x128xf32>
    %12 = vector.broadcast %10 : vector<1x128xf32> to vector<16x128xf32>
    %13 = arith.addf %11, %12 : vector<16x128xf32>
    %cst_11 = arith.constant 0.000000e+00 : f32
    %14 = vector.broadcast %cst_11 : f32 to vector<16x128xf32>
    %15 = arith.maximumf %13, %14 : vector<16x128xf32>
    %16 = arith.truncf %15 : vector<16x128xf32> to vector<16x128xbf16>
    %c0_12 = arith.constant 0 : index
    %c0_13 = arith.constant 0 : index
    %17 = vector.load %arg6[%c0_12, %c0_13] : memref<128x128xbf16, #tpu.memory_space<vmem>>, vector<128x128xbf16>
    %c0_14 = arith.constant 0 : index
    %c0_15 = arith.constant 0 : index
    %18 = vector.load %arg7[%c0_14, %c0_15] : memref<1x128xf32, #tpu.memory_space<vmem>>, vector<1x128xf32>
    %cst_16 = arith.constant dense<0.000000e+00> : vector<16x128xf32>
    %19 = tpu.matmul %16, %17, %cst_16 {dimension_numbers = #tpu.dot_dimension_numbers<[1], [0], [0], [1], [0, 0, 1, 1], [], []>} : vector<16x128xbf16>, vector<128x128xbf16>, vector<16x128xf32> -> vector<16x128xf32>
    %20 = vector.broadcast %18 : vector<1x128xf32> to vector<16x128xf32>
    %21 = arith.addf %19, %20 : vector<16x128xf32>
    %cst_17 = arith.constant 0.000000e+00 : f32
    %22 = vector.broadcast %cst_17 : f32 to vector<16x128xf32>
    %23 = arith.maximumf %21, %22 : vector<16x128xf32>
    %24 = arith.truncf %23 : vector<16x128xf32> to vector<16x128xbf16>
    %c0_18 = arith.constant 0 : index
    %c0_19 = arith.constant 0 : index
    %25 = vector.load %arg8[%c0_18, %c0_19] : memref<128x128xbf16, #tpu.memory_space<vmem>>, vector<128x128xbf16>
    %c0_20 = arith.constant 0 : index
    %c0_21 = arith.constant 0 : index
    %26 = vector.load %arg9[%c0_20, %c0_21] : memref<1x128xf32, #tpu.memory_space<vmem>>, vector<1x128xf32>
    %cst_22 = arith.constant dense<0.000000e+00> : vector<16x128xf32>
    %27 = tpu.matmul %24, %25, %cst_22 {dimension_numbers = #tpu.dot_dimension_numbers<[1], [0], [0], [1], [0, 0, 1, 1], [], []>} : vector<16x128xbf16>, vector<128x128xbf16>, vector<16x128xf32> -> vector<16x128xf32>
    %28 = vector.broadcast %26 : vector<1x128xf32> to vector<16x128xf32>
    %29 = arith.addf %27, %28 : vector<16x128xf32>
    %c0_23 = arith.constant 0 : index
    %c0_24 = arith.constant 0 : index
    %30 = vector.load %arg10[%c0_23, %c0_24] : memref<16x128xf32, #tpu.memory_space<vmem>>, vector<16x128xf32>
    tpu.vector_store %arg10[%c0_23, %c0_24], %29 {strides = array<i32>} : memref<16x128xf32, #tpu.memory_space<vmem>>, vector<16x128xf32>,
    return
  }
  func.func @transform_0(%arg0: i32) -> (i32, i32) {
    %c0_i32 = arith.constant 0 : i32
    %c0_i32_0 = arith.constant 0 : i32
    return %arg0, %c0_i32 : i32, i32
  }
  func.func @transform_1(%arg0: i32) -> (i32, i32) {
    %c0_i32 = arith.constant 0 : i32
    %c0_i32_0 = arith.constant 0 : i32
    %c0_i32_1 = arith.constant 0 : i32
    return %c0_i32, %c0_i32_0 : i32, i32
  }
  func.func @transform_2(%arg0: i32) -> (i32, i32) {
    %c0_i32 = arith.constant 0 : i32
    %c0_i32_0 = arith.constant 0 : i32
    %c0_i32_1 = arith.constant 0 : i32
    return %c0_i32, %c0_i32_0 : i32, i32
  }
  func.func @transform_3(%arg0: i32) -> (i32, i32) {
    %c0_i32 = arith.constant 0 : i32
    %c0_i32_0 = arith.constant 0 : i32
    %c0_i32_1 = arith.constant 0 : i32
    return %c0_i32, %c0_i32_0 : i32, i32
  }
  func.func @transform_4(%arg0: i32) -> (i32, i32) {
    %c0_i32 = arith.constant 0 : i32
    %c0_i32_0 = arith.constant 0 : i32
    %c0_i32_1 = arith.constant 0 : i32
    return %c0_i32, %c0_i32_0 : i32, i32
  }
  func.func @transform_5(%arg0: i32) -> (i32, i32) {
    %c0_i32 = arith.constant 0 : i32
    %c0_i32_0 = arith.constant 0 : i32
    %c0_i32_1 = arith.constant 0 : i32
    return %c0_i32, %c0_i32_0 : i32, i32
  }
  func.func @transform_6(%arg0: i32) -> (i32, i32) {
    %c0_i32 = arith.constant 0 : i32
    %c0_i32_0 = arith.constant 0 : i32
    %c0_i32_1 = arith.constant 0 : i32
    return %c0_i32, %c0_i32_0 : i32, i32
  }
  func.func @transform_7(%arg0: i32) -> (i32, i32) {
    %c0_i32 = arith.constant 0 : i32
    %c0_i32_0 = arith.constant 0 : i32
    %c0_i32_1 = arith.constant 0 : i32
    return %c0_i32, %c0_i32_0 : i32, i32
  }
  func.func @transform_8(%arg0: i32) -> (i32, i32) {
    %c0_i32 = arith.constant 0 : i32
    %c0_i32_0 = arith.constant 0 : i32
    %c0_i32_1 = arith.constant 0 : i32
    return %c0_i32, %c0_i32_0 : i32, i32
  }
  func.func @transform_9(%arg0: i32) -> (i32, i32) {
    %c0_i32 = arith.constant 0 : i32
    %c0_i32_0 = arith.constant 0 : i32
    return %arg0, %c0_i32 : i32, i32
  }
}

</mosaic_0001>

<bundles_post_ra>
// kernel: prodnet_forward.1
= control target key start
LH: loop header
LB: loop body
LE: loop exit
PB: predicated region body
PF: predicated region fallthrough
CT: control target
= control target key end

     0   :  { %14 = vsyncpa [#allocation3], 0  ;;  %s985_s0 = inlined_call_operand.vmem [shape: bf16[16,128], index: 0, kind: input, shape index: {}]   ;;  %s986_s1 = inlined_call_operand.hbm [shape: bf16[128,128], index: 1, kind: input, shape index: {}]   ;;  %s987_s2 = inlined_call_operand.vmem [shape: f32[1,128], index: 2, kind: input, shape index: {}]   ;;  %s988_s3 = inlined_call_operand.hbm [shape: bf16[128,128], index: 3, kind: input, shape index: {}]   ;;  %s989_s4 = inlined_call_operand.vmem [shape: f32[1,128], index: 4, kind: input, shape index: {}]   ;;  %s990_s5 = inlined_call_operand.hbm [shape: bf16[128,128], index: 5, kind: input, shape index: {}]   ;;  %s991_s6 = inlined_call_operand.vmem [shape: f32[1,128], index: 6, kind: input, shape index: {}]   ;;  %s992_s7 = inlined_call_operand.hbm [shape: bf16[128,128], index: 7, kind: input, shape index: {}]   ;;  %s993_s8 = inlined_call_operand.vmem [shape: f32[1,128], index: 8, kind: input, shape index: {}]   ;;  %s994_s9 = inlined_call_operand.vmem [shape: f32[16,128], index: 9, kind: output, shape index: {}]  }
   0x1   :  { %15 = vsyncpa [#allocation5], 0 }
   0x2   :  { %16 = vsyncpa [#allocation8], 0  ;;  %s842_s30 = smov [#allocation4]   ;;  %s843_s11 = smov [#allocation2]  }
   0x3   :  { %s38_s10 = sshll.u32 %s842_s30, 4  ;;  %s24_s12 = sshll.u32 %s843_s11, 4  ;;  %s39_s10 = int_to_ptr.vmem [resolvable:$true] %s38_s10  ;;  %s25_s12 = int_to_ptr.vmem [resolvable:$true] %s24_s12 }
   0x4   :  { %s764_s13 = scalar_lea.vmem %s39_s10, 1024  ;;  %p769_p1 = scmp.lt.s32.totalorder %s39_s10, %s39_s10 }
   0x5   :  { %p765_p0 = scmp.ne.s32.totalorder %s39_s10, %s764_s13  ;;  %p770_p2 = scmp.lt.s32.totalorder %s764_s13, %s764_s13 }
   0x7   :  { %p771_p3 = por %p770_p2, %p769_p1 }
   0x9   :  { %p772_p4 = pnand %p771_p3, %p765_p0 }
   0xb   :  { %775 = shalt.err (!%p772_p4)
}
   0xc   :  { %s844_s14 = smov 64   ;;  %s845_s15 = smov 4  }
   0xd   :  { %44 = dma.hbm_to_vmem [thread:$0]  %s988_s3, 1024, %s39_s10, [#allocation5], %s844_s14, %s844_s14, %s845_s15  }
   0xe   :  { %s784_s18 = scalar_lea.vmem %s25_s12, 1024  ;;  %p789_p6 = scmp.lt.s32.totalorder %s25_s12, %s25_s12 }
   0xf   :  { %p785_p5 = scmp.ne.s32.totalorder %s25_s12, %s784_s18  ;;  %p790_p7 = scmp.lt.s32.totalorder %s784_s18, %s784_s18 }
  0x11   :  { %p791_p8 = por %p790_p7, %p789_p6 }
  0x13   :  { %p792_p9 = pnand %p791_p8, %p785_p5 }
  0x15   :  { %795 = shalt.err (!%p792_p9)
}
  0x16   :  { %30 = dma.hbm_to_vmem [thread:$0]  %s986_s1, 1024, %s25_s12, [#allocation3], %s844_s14, %s844_s14, %s845_s15  }
  0x17   :  { %s846_s21 = smov [#allocation6]   ;;  %s847_s23 = smov [#allocation7]  }
  0x18   :  { %s52_s22 = sshll.u32 %s846_s21, 4  ;;  %s66_s24 = sshll.u32 %s847_s23, 4  ;;  %s53_s22 = int_to_ptr.vmem [resolvable:$true] %s52_s22  ;;  %s67_s24 = int_to_ptr.vmem [resolvable:$true] %s66_s24 }
  0x19   :  { %s804_s3 = scalar_lea.vmem %s53_s22, 1024  ;;  %p809_p11 = scmp.lt.s32.totalorder %s53_s22, %s53_s22 }
  0x1a   :  { %p805_p10 = scmp.ne.s32.totalorder %s53_s22, %s804_s3  ;;  %p810_p12 = scmp.lt.s32.totalorder %s804_s3, %s804_s3 }
  0x1c   :  { %p811_p13 = por %p810_p12, %p809_p11 }
  0x1e   :  { %p812_p0 = pnand %p811_p13, %p805_p10 }
  0x20   :  { %815 = shalt.err (!%p812_p0)
}
  0x21   :  { %58 = dma.hbm_to_vmem [thread:$0]  %s990_s5, 1024, %s53_s22, [#allocation5], %s844_s14, %s844_s14, %s845_s15  }
  0x22   :  { %s824_s1 = scalar_lea.vmem %s67_s24, 1024  ;;  %p829_p2 = scmp.lt.s32.totalorder %s67_s24, %s67_s24 }
  0x23   :  { %p825_p1 = scmp.ne.s32.totalorder %s67_s24, %s824_s1  ;;  %p830_p3 = scmp.lt.s32.totalorder %s824_s1, %s824_s1 }
  0x25   :  { %p831_p4 = por %p830_p3, %p829_p2 }
  0x27   :  { %p832_p5 = pnand %p831_p4, %p825_p1 }
  0x29   :  { %835 = shalt.err (!%p832_p5)
}
  0x2a   :  { %72 = dma.hbm_to_vmem [thread:$0]  %s992_s7, 1024, %s67_s24, [#allocation8], %s844_s14, %s844_s14, %s845_s15  }
  0x2b   :  { %836 = dma.done.wait [#allocation3], 1024  }
  0x2c   :  { %837 = vsyncadd [#allocation3], 4294966272 }
  0x2d   :  { %838 = dma.done.wait [#allocation5], 2048  }
  0x2e   :  { %839 = vsyncadd [#allocation5], 4294965248 }
  0x2f   :  { %840 = dma.done.wait [#allocation8], 1024  }
  0x30   :  { %841 = vsyncadd [#allocation8], 4294966272  ;;  %v848_v0 = vmov 0.0   ;;  %vm849_vm0 = vmmov 0   ;;  %v723_v1 = vld [vmem:[#allocation2 + $0x38] sm:$0xff]   ;;  %v724_v2 = vld [vmem:[#allocation2 + $0x30] sm:$0xff]  }
  0x31   :  { %635 = vmatprep.subr.bf16.mxu0 %v848_v0  ;;  %651 = vmatprep.mubr.msk.bf16.mxu0 %vm849_vm0, %v848_v0  ;;  %v725_v3 = vld [vmem:[#allocation2 + $0x28] sm:$0xff]   ;;  %v732_v4 = vld [vmem:[#allocation4 + $0x38] sm:$0xff]   ;;  %v726_v5 = vld [vmem:[#allocation2 + $0x20] sm:$0xff]  }
  0x32   :  { %655 = vmatprep.subr.bf16.mxu1 %v848_v0  ;;  %671 = vmatprep.mubr.msk.bf16.mxu1 %vm849_vm0, %v848_v0  ;;  %v733_v6 = vld [vmem:[#allocation4 + $0x30] sm:$0xff]   ;;  %v727_v7 = vld [vmem:[#allocation2 + $0x18] sm:$0xff]   ;;  %v734_v8 = vld [vmem:[#allocation4 + $0x28] sm:$0xff]  }
  0x33   :  { %636 = vmatpush3.bf16.msra.mxu0 %v723_v1  ;;  %656 = vmatpush3.bf16.msra.mxu1 %v732_v4  ;;  %v728_v9 = vld [vmem:[#allocation2 + $0x10] sm:$0xff]   ;;  %v735_v10 = vld [vmem:[#allocation4 + $0x20] sm:$0xff]   ;;  %v729_v11 = vld [vmem:[#allocation2 + $0x8] sm:$0xff]  }
  0x34   :  { %637 = vmatprep.subr.bf16.mxu0 %v848_v0  ;;  %657 = vmatprep.subr.bf16.mxu1 %v848_v0  ;;  %v736_v12 = vld [vmem:[#allocation4 + $0x18] sm:$0xff]   ;;  %v730_v13 = vld [vmem:[#allocation2] sm:$0xff]   ;;  %v737_v15 = vld [vmem:[#allocation4 + $0x10] sm:$0xff]  }
  0x35   :  { %v731_v14 = vld [vmem:[%s985_s0] sm:$0xff]   ;;  %v738_v16 = vld [vmem:[#allocation4 + $0x8] sm:$0xff]   ;;  %v740_v18 = vld [vmem:[#allocation6 + $0x38] sm:$0xff]  }
  0x36   :  { %v739_v17 = vld [vmem:[#allocation4] sm:$0xff]   ;;  %v741_v19 = vld [vmem:[#allocation6 + $0x30] sm:$0xff]   ;;  %v742_v20 = vld [vmem:[#allocation6 + $0x28] sm:$0xff]  }
  0x37   :  { %638 = vmatpush3.bf16.msra.mxu0 %v724_v2  ;;  %658 = vmatpush3.bf16.msra.mxu1 %v733_v6  ;;  %v743_v21 = vld [vmem:[#allocation6 + $0x20] sm:$0xff]   ;;  %v744_v22 = vld [vmem:[#allocation6 + $0x18] sm:$0xff]   ;;  %v745_v33 = vld [vmem:[#allocation6 + $0x10] sm:$0xff]  }
  0x38   :  { %639 = vmatprep.subr.bf16.mxu0 %v848_v0  ;;  %659 = vmatprep.subr.bf16.mxu1 %v848_v0  ;;  %v562_v23 = vld [vmem:[%s987_s2] ss:$0 sm:$0xff]  ;;  %v746_v34 = vld [vmem:[#allocation6 + $0x8] sm:$0xff]   ;;  %v748_v36 = vld [vmem:[#allocation7 + $0x38] sm:$0xff]  }
  0x39   :  { %v747_v35 = vld [vmem:[#allocation6] sm:$0xff]   ;;  %v749_v37 = vld [vmem:[#allocation7 + $0x30] sm:$0xff]   ;;  %v750_v38 = vld [vmem:[#allocation7 + $0x28] sm:$0xff]  }
  0x3a   :  { %v751_v39 = vld [vmem:[#allocation7 + $0x20] sm:$0xff]   ;;  %v752_v40 = vld [vmem:[#allocation7 + $0x18] sm:$0xff]   ;;  %v753_v51 = vld [vmem:[#allocation7 + $0x10] sm:$0xff]  }
  0x3b   :  { %640 = vmatpush3.bf16.msra.mxu0 %v725_v3  ;;  %660 = vmatpush3.bf16.msra.mxu1 %v734_v8  ;;  %v572_v41 = vld [vmem:[%s989_s4] ss:$0 sm:$0xff]  ;;  %v754_v52 = vld [vmem:[#allocation7 + $0x8] sm:$0xff]  }
  0x3c   :  { %641 = vmatprep.subr.bf16.mxu0 %v848_v0  ;;  %661 = vmatprep.subr.bf16.mxu1 %v848_v0  ;;  %v755_v53 = vld [vmem:[#allocation7] sm:$0xff]  }
  0x3d   :  { %v581_v54 = vld [vmem:[%s991_s6] ss:$0 sm:$0xff] }
  0x3f   :  { %642 = vmatpush3.bf16.msra.mxu0 %v726_v5  ;;  %662 = vmatpush3.bf16.msra.mxu1 %v735_v10 }
  0x40   :  { %643 = vmatprep.subr.bf16.mxu0 %v848_v0  ;;  %663 = vmatprep.subr.bf16.mxu1 %v848_v0 }
  0x43   :  { %644 = vmatpush3.bf16.msra.mxu0 %v727_v7  ;;  %664 = vmatpush3.bf16.msra.mxu1 %v736_v12 }
  0x44   :  { %645 = vmatprep.subr.bf16.mxu0 %v848_v0  ;;  %665 = vmatprep.subr.bf16.mxu1 %v848_v0 }
  0x47   :  { %646 = vmatpush3.bf16.msra.mxu0 %v728_v9  ;;  %666 = vmatpush3.bf16.msra.mxu1 %v737_v15 }
  0x48   :  { %647 = vmatprep.subr.bf16.mxu0 %v848_v0  ;;  %667 = vmatprep.subr.bf16.mxu1 %v848_v0 }
  0x4b   :  { %648 = vmatpush3.bf16.msra.mxu0 %v729_v11  ;;  %668 = vmatpush3.bf16.msra.mxu1 %v738_v16 }
  0x4c   :  { %649 = vmatprep.subr.bf16.mxu0 %v848_v0  ;;  %669 = vmatprep.subr.bf16.mxu1 %v848_v0 }
  0x4f   :  { %650 = vmatpush3.bf16.msra.mxu0 %v730_v13  ;;  %670 = vmatpush3.bf16.msra.mxu1 %v739_v17 }
  0x50   :  { %675 = vmatprep.subr.bf16.mxu0 %v848_v0  ;;  %695 = vmatprep.subr.bf16.mxu1 %v848_v0 }
  0x52   :  { %652 = vmatmul.mubr.bf16.vlgmr.msra.gmra.mxu0 %v731_v14 }
  0x53   :  { %691 = vmatprep.mubr.msk.bf16.mxu0 %vm849_vm0, %v848_v0  ;;  %676 = vmatpush3.bf16.msra.mxu0 %v740_v18 }
  0x54   :  { %677 = vmatprep.subr.bf16.mxu0 %v848_v0 }
  0x57   :  { %678 = vmatpush3.bf16.msra.mxu0 %v741_v19 }
  0x58   :  { %679 = vmatprep.subr.bf16.mxu0 %v848_v0 }
  0x5b   :  { %680 = vmatpush3.bf16.msra.mxu0 %v742_v20 }
  0x5c   :  { %681 = vmatprep.subr.bf16.mxu0 %v848_v0 }
  0x5f   :  { %682 = vmatpush3.bf16.msra.mxu0 %v743_v21 }
  0x60   :  { %683 = vmatprep.subr.bf16.mxu0 %v848_v0 }
  0x63   :  { %684 = vmatpush3.bf16.msra.mxu0 %v744_v22 }
  0x64   :  { %685 = vmatprep.subr.bf16.mxu0 %v848_v0 }
  0x67   :  { %686 = vmatpush3.bf16.msra.mxu0 %v745_v33 }
  0x68   :  { %687 = vmatprep.subr.bf16.mxu0 %v848_v0 }
  0x6b   :  { %688 = vmatpush3.bf16.msra.mxu0 %v746_v34 }
  0x6c   :  { %689 = vmatprep.subr.bf16.mxu0 %v848_v0 }
  0x6f   :  { %690 = vmatpush3.bf16.msra.mxu0 %v747_v35 }
 0x112   :  { %v201_v24 = vpop.f32.mrf.mxu0 }
 0x113   :  { %v202_v26 = vadd.f32 %v562_v23, %v201_v24 }
 0x114   :  { %v653_v25 = vpop.f32.mrf.mxu0 }
 0x115   :  { %v208_v30 = vmax.f32 %v202_v26, 0.0 }
 0x116   :  { %v204_v27 = vpop.f32.mrf.mxu0 }
 0x117   :  { %v205_v28 = vadd.f32 %v562_v23, %v204_v27 }
 0x118   :  { %v654_v29 = vpop.f32.mrf.mxu0 }
 0x119   :  { %v209_v31 = vmax.f32 %v205_v28, 0.0 }
 0x11b   :  { %v210_v32 = vpack.c.bf16 %v209_v31, %v208_v30 }
 0x11d   :  { %672 = vmatmul.mubr.bf16.vlgmr.msra.gmra.mxu1 %v210_v32 }
 0x11e   :  { %711 = vmatprep.mubr.msk.bf16.mxu1 %vm849_vm0, %v848_v0  ;;  %696 = vmatpush3.bf16.msra.mxu1 %v748_v36 }
 0x11f   :  { %697 = vmatprep.subr.bf16.mxu1 %v848_v0 }
 0x122   :  { %698 = vmatpush3.bf16.msra.mxu1 %v749_v37 }
 0x123   :  { %699 = vmatprep.subr.bf16.mxu1 %v848_v0 }
 0x126   :  { %700 = vmatpush3.bf16.msra.mxu1 %v750_v38 }
 0x127   :  { %701 = vmatprep.subr.bf16.mxu1 %v848_v0 }
 0x12a   :  { %702 = vmatpush3.bf16.msra.mxu1 %v751_v39 }
 0x12b   :  { %703 = vmatprep.subr.bf16.mxu1 %v848_v0 }
 0x12e   :  { %704 = vmatpush3.bf16.msra.mxu1 %v752_v40 }
 0x12f   :  { %705 = vmatprep.subr.bf16.mxu1 %v848_v0 }
 0x132   :  { %706 = vmatpush3.bf16.msra.mxu1 %v753_v51 }
 0x133   :  { %707 = vmatprep.subr.bf16.mxu1 %v848_v0 }
 0x136   :  { %708 = vmatpush3.bf16.msra.mxu1 %v754_v52 }
 0x137   :  { %709 = vmatprep.subr.bf16.mxu1 %v848_v0  ;;  %v590_v0 = vld [vmem:[%s993_s8] ss:$0 sm:$0xff] }
 0x13a   :  { %710 = vmatpush3.bf16.msra.mxu1 %v755_v53 }
 0x1dd   :  { %v316_v42 = vpop.f32.mrf.mxu1 }
 0x1de   :  { %v317_v44 = vadd.f32 %v572_v41, %v316_v42 }
 0x1df   :  { %v673_v43 = vpop.f32.mrf.mxu1 }
 0x1e0   :  { %v323_v48 = vmax.f32 %v317_v44, 0.0 }
 0x1e1   :  { %v319_v45 = vpop.f32.mrf.mxu1 }
 0x1e2   :  { %v320_v46 = vadd.f32 %v572_v41, %v319_v45 }
 0x1e3   :  { %v674_v47 = vpop.f32.mrf.mxu1 }
 0x1e4   :  { %v324_v49 = vmax.f32 %v320_v46, 0.0 }
 0x1e6   :  { %v325_v50 = vpack.c.bf16 %v324_v49, %v323_v48 }
 0x1e8   :  { %692 = vmatmul.mubr.bf16.vlgmr.msra.gmra.mxu0 %v325_v50 }
 0x2a8   :  { %v431_v55 = vpop.f32.mrf.mxu0 }
 0x2a9   :  { %v432_v57 = vadd.f32 %v581_v54, %v431_v55 }
 0x2aa   :  { %v693_v56 = vpop.f32.mrf.mxu0 }
 0x2ab   :  { %v438_v61 = vmax.f32 %v432_v57, 0.0 }
 0x2ac   :  { %v434_v58 = vpop.f32.mrf.mxu0 }
 0x2ad   :  { %v435_v59 = vadd.f32 %v581_v54, %v434_v58 }
 0x2ae   :  { %v694_v60 = vpop.f32.mrf.mxu0 }
 0x2af   :  { %v439_v62 = vmax.f32 %v435_v59, 0.0 }
 0x2b1   :  { %v440_v63 = vpack.c.bf16 %v439_v62, %v438_v61 }
 0x2b3   :  { %712 = vmatmul.mubr.bf16.vlgmr.msra.gmra.mxu1 %v440_v63 }
 0x373   :  { %v546_v1 = vpop.f32.mrf.mxu1 }
 0x374   :  { %v547_v2 = vadd.f32 %v590_v0, %v546_v1 }
 0x375   :  { %v713_v3 = vpop.f32.mrf.mxu1 }
 0x376   :  { %553 = vst [vmem:[%s994_s9] sm:$0xff] %v547_v2 }
 0x377   :  { %v549_v4 = vpop.f32.mrf.mxu1 }
 0x378   :  { %v550_v5 = vadd.f32 %v590_v0, %v549_v4 }
 0x379   :  { %v714_v6 = vpop.f32.mrf.mxu1 }
 0x37a   :  { %554 = vst [vmem:[%s994_s9 + $0x8] sm:$0xff] %v550_v5 }
 0x37b   :  { %559 = vsyncpa [#allocation3], 1 }
 0x37c   :  { %560 = vsyncpa [#allocation5], 1 }
 0x37d   :  { %561 = vsyncpa [#allocation8], 1 }

// kernel: prodnet_forward.1
= control target key start
LH: loop header
LB: loop body
LE: loop exit
PB: predicated region body
PF: predicated region fallthrough
CT: control target
= control target key end

     0   :  { %14 = vsyncpa [#allocation3], 0  ;;  %s985_s0 = inlined_call_operand.vmem [shape: bf16[16,128], index: 0, kind: input, shape index: {}]   ;;  %s986_s1 = inlined_call_operand.hbm [shape: bf16[128,128], index: 1, kind: input, shape index: {}]   ;;  %s987_s2 = inlined_call_operand.vmem [shape: f32[1,128], index: 2, kind: input, shape index: {}]   ;;  %s988_s3 = inlined_call_operand.hbm [shape: bf16[128,128], index: 3, kind: input, shape index: {}]   ;;  %s989_s4 = inlined_call_operand.vmem [shape: f32[1,128], index: 4, kind: input, shape index: {}]   ;;  %s990_s5 = inlined_call_operand.hbm [shape: bf16[128,128], index: 5, kind: input, shape index: {}]   ;;  %s991_s6 = inlined_call_operand.vmem [shape: f32[1,128], index: 6, kind: input, shape index: {}]   ;;  %s992_s7 = inlined_call_operand.hbm [shape: bf16[128,128], index: 7, kind: input, shape index: {}]   ;;  %s993_s8 = inlined_call_operand.vmem [shape: f32[1,128], index: 8, kind: input, shape index: {}]   ;;  %s994_s9 = inlined_call_operand.vmem [shape: f32[16,128], index: 9, kind: output, shape index: {}]  }
   0x1   :  { %15 = vsyncpa [#allocation5], 0 }
   0x2   :  { %16 = vsyncpa [#allocation8], 0  ;;  %s842_s30 = smov [#allocation4]   ;;  %s843_s11 = smov [#allocation2]  }
   0x3   :  { %s38_s10 = sshll.u32 %s842_s30, 4  ;;  %s24_s12 = sshll.u32 %s843_s11, 4  ;;  %s39_s10 = int_to_ptr.vmem [resolvable:$true] %s38_s10  ;;  %s25_s12 = int_to_ptr.vmem [resolvable:$true] %s24_s12 }
   0x4   :  { %s764_s13 = scalar_lea.vmem %s39_s10, 1024  ;;  %p769_p1 = scmp.lt.s32.totalorder %s39_s10, %s39_s10 }
   0x5   :  { %p765_p0 = scmp.ne.s32.totalorder %s39_s10, %s764_s13  ;;  %p770_p2 = scmp.lt.s32.totalorder %s764_s13, %s764_s13 }
   0x7   :  { %p771_p3 = por %p770_p2, %p769_p1 }
   0x9   :  { %p772_p4 = pnand %p771_p3, %p765_p0 }
   0xb   :  { %775 = shalt.err (!%p772_p4)
}
   0xc   :  { %s844_s14 = smov 64   ;;  %s845_s15 = smov 4  }
   0xd   :  { %44 = dma.hbm_to_vmem [thread:$0]  %s988_s3, 1024, %s39_s10, [#allocation5], %s844_s14, %s844_s14, %s845_s15  }
   0xe   :  { %s784_s18 = scalar_lea.vmem %s25_s12, 1024  ;;  %p789_p6 = scmp.lt.s32.totalorder %s25_s12, %s25_s12 }
   0xf   :  { %p785_p5 = scmp.ne.s32.totalorder %s25_s12, %s784_s18  ;;  %p790_p7 = scmp.lt.s32.totalorder %s784_s18, %s784_s18 }
  0x11   :  { %p791_p8 = por %p790_p7, %p789_p6 }
  0x13   :  { %p792_p9 = pnand %p791_p8, %p785_p5 }
  0x15   :  { %795 = shalt.err (!%p792_p9)
}
  0x16   :  { %30 = dma.hbm_to_vmem [thread:$0]  %s986_s1, 1024, %s25_s12, [#allocation3], %s844_s14, %s844_s14, %s845_s15  }
  0x17   :  { %s846_s21 = smov [#allocation6]   ;;  %s847_s23 = smov [#allocation7]  }
  0x18   :  { %s52_s22 = sshll.u32 %s846_s21, 4  ;;  %s66_s24 = sshll.u32 %s847_s23, 4  ;;  %s53_s22 = int_to_ptr.vmem [resolvable:$true] %s52_s22  ;;  %s67_s24 = int_to_ptr.vmem [resolvable:$true] %s66_s24 }
  0x19   :  { %s804_s3 = scalar_lea.vmem %s53_s22, 1024  ;;  %p809_p11 = scmp.lt.s32.totalorder %s53_s22, %s53_s22 }
  0x1a   :  { %p805_p10 = scmp.ne.s32.totalorder %s53_s22, %s804_s3  ;;  %p810_p12 = scmp.lt.s32.totalorder %s804_s3, %s804_s3 }
  0x1c   :  { %p811_p13 = por %p810_p12, %p809_p11 }
  0x1e   :  { %p812_p0 = pnand %p811_p13, %p805_p10 }
  0x20   :  { %815 = shalt.err (!%p812_p0)
}
  0x21   :  { %58 = dma.hbm_to_vmem [thread:$0]  %s990_s5, 1024, %s53_s22, [#allocation5], %s844_s14, %s844_s14, %s845_s15  }
  0x22   :  { %s824_s1 = scalar_lea.vmem %s67_s24, 1024  ;;  %p829_p2 = scmp.lt.s32.totalorder %s67_s24, %s67_s24 }
  0x23   :  { %p825_p1 = scmp.ne.s32.totalorder %s67_s24, %s824_s1  ;;  %p830_p3 = scmp.lt.s32.totalorder %s824_s1, %s824_s1 }
  0x25   :  { %p831_p4 = por %p830_p3, %p829_p2 }
  0x27   :  { %p832_p5 = pnand %p831_p4, %p825_p1 }
  0x29   :  { %835 = shalt.err (!%p832_p5)
}
  0x2a   :  { %72 = dma.hbm_to_vmem [thread:$0]  %s992_s7, 1024, %s67_s24, [#allocation8], %s844_s14, %s844_s14, %s845_s15  }
  0x2b   :  { %836 = dma.done.wait [#allocation3], 1024  }
  0x2c   :  { %837 = vsyncadd [#allocation3], 4294966272 }
  0x2d   :  { %838 = dma.done.wait [#allocation5], 2048  }
  0x2e   :  { %839 = vsyncadd [#allocation5], 4294965248 }
  0x2f   :  { %840 = dma.done.wait [#allocation8], 1024  }
  0x30   :  { %841 = vsyncadd [#allocation8], 4294966272  ;;  %v848_v0 = vmov 0.0   ;;  %vm849_vm0 = vmmov 0   ;;  %v723_v1 = vld [vmem:[#allocation2 + $0x38] sm:$0xff]   ;;  %v724_v2 = vld [vmem:[#allocation2 + $0x30] sm:$0xff]  }
  0x31   :  { %635 = vmatprep.subr.bf16.mxu0 %v848_v0  ;;  %651 = vmatprep.mubr.msk.bf16.mxu0 %vm849_vm0, %v848_v0  ;;  %v725_v3 = vld [vmem:[#allocation2 + $0x28] sm:$0xff]   ;;  %v732_v4 = vld [vmem:[#allocation4 + $0x38] sm:$0xff]   ;;  %v726_v5 = vld [vmem:[#allocation2 + $0x20] sm:$0xff]  }
  0x32   :  { %655 = vmatprep.subr.bf16.mxu1 %v848_v0  ;;  %671 = vmatprep.mubr.msk.bf16.mxu1 %vm849_vm0, %v848_v0  ;;  %v733_v6 = vld [vmem:[#allocation4 + $0x30] sm:$0xff]   ;;  %v727_v7 = vld [vmem:[#allocation2 + $0x18] sm:$0xff]   ;;  %v734_v8 = vld [vmem:[#allocation4 + $0x28] sm:$0xff]  }
  0x33   :  { %636 = vmatpush3.bf16.msra.mxu0 %v723_v1  ;;  %656 = vmatpush3.bf16.msra.mxu1 %v732_v4  ;;  %v728_v9 = vld [vmem:[#allocation2 + $0x10] sm:$0xff]   ;;  %v735_v10 = vld [vmem:[#allocation4 + $0x20] sm:$0xff]   ;;  %v729_v11 = vld [vmem:[#allocation2 + $0x8] sm:$0xff]  }
  0x34   :  { %637 = vmatprep.subr.bf16.mxu0 %v848_v0  ;;  %657 = vmatprep.subr.bf16.mxu1 %v848_v0  ;;  %v736_v12 = vld [vmem:[#allocation4 + $0x18] sm:$0xff]   ;;  %v730_v13 = vld [vmem:[#allocation2] sm:$0xff]   ;;  %v737_v15 = vld [vmem:[#allocation4 + $0x10] sm:$0xff]  }
  0x35   :  { %v731_v14 = vld [vmem:[%s985_s0] sm:$0xff]   ;;  %v738_v16 = vld [vmem:[#allocation4 + $0x8] sm:$0xff]   ;;  %v740_v18 = vld [vmem:[#allocation6 + $0x38] sm:$0xff]  }
  0x36   :  { %v739_v17 = vld [vmem:[#allocation4] sm:$0xff]   ;;  %v741_v19 = vld [vmem:[#allocation6 + $0x30] sm:$0xff]   ;;  %v742_v20 = vld [vmem:[#allocation6 + $0x28] sm:$0xff]  }
  0x37   :  { %638 = vmatpush3.bf16.msra.mxu0 %v724_v2  ;;  %658 = vmatpush3.bf16.msra.mxu1 %v733_v6  ;;  %v743_v21 = vld [vmem:[#allocation6 + $0x20] sm:$0xff]   ;;  %v744_v22 = vld [vmem:[#allocation6 + $0x18] sm:$0xff]   ;;  %v745_v33 = vld [vmem:[#allocation6 + $0x10] sm:$0xff]  }
  0x38   :  { %639 = vmatprep.subr.bf16.mxu0 %v848_v0  ;;  %659 = vmatprep.subr.bf16.mxu1 %v848_v0  ;;  %v562_v23 = vld [vmem:[%s987_s2] ss:$0 sm:$0xff]  ;;  %v746_v34 = vld [vmem:[#allocation6 + $0x8] sm:$0xff]   ;;  %v748_v36 = vld [vmem:[#allocation7 + $0x38] sm:$0xff]  }
  0x39   :  { %v747_v35 = vld [vmem:[#allocation6] sm:$0xff]   ;;  %v749_v37 = vld [vmem:[#allocation7 + $0x30] sm:$0xff]   ;;  %v750_v38 = vld [vmem:[#allocation7 + $0x28] sm:$0xff]  }
  0x3a   :  { %v751_v39 = vld [vmem:[#allocation7 + $0x20] sm:$0xff]   ;;  %v752_v40 = vld [vmem:[#allocation7 + $0x18] sm:$0xff]   ;;  %v753_v51 = vld [vmem:[#allocation7 + $0x10] sm:$0xff]  }
  0x3b   :  { %640 = vmatpush3.bf16.msra.mxu0 %v725_v3  ;;  %660 = vmatpush3.bf16.msra.mxu1 %v734_v8  ;;  %v572_v41 = vld [vmem:[%s989_s4] ss:$0 sm:$0xff]  ;;  %v754_v52 = vld [vmem:[#allocation7 + $0x8] sm:$0xff]  }
  0x3c   :  { %641 = vmatprep.subr.bf16.mxu0 %v848_v0  ;;  %661 = vmatprep.subr.bf16.mxu1 %v848_v0  ;;  %v755_v53 = vld [vmem:[#allocation7] sm:$0xff]  }
  0x3d   :  { %v581_v54 = vld [vmem:[%s991_s6] ss:$0 sm:$0xff] }
  0x3f   :  { %642 = vmatpush3.bf16.msra.mxu0 %v726_v5  ;;  %662 = vmatpush3.bf16.msra.mxu1 %v735_v10 }
  0x40   :  { %643 = vmatprep.subr.bf16.mxu0 %v848_v0  ;;  %663 = vmatprep.subr.bf16.mxu1 %v848_v0 }
  0x43   :  { %644 = vmatpush3.bf16.msra.mxu0 %v727_v7  ;;  %664 = vmatpush3.bf16.msra.mxu1 %v736_v12 }
  0x44   :  { %645 = vmatprep.subr.bf16.mxu0 %v848_v0  ;;  %665 = vmatprep.subr.bf16.mxu1 %v848_v0 }
  0x47   :  { %646 = vmatpush3.bf16.msra.mxu0 %v728_v9  ;;  %666 = vmatpush3.bf16.msra.mxu1 %v737_v15 }
  0x48   :  { %647 = vmatprep.subr.bf16.mxu0 %v848_v0  ;;  %667 = vmatprep.subr.bf16.mxu1 %v848_v0 }
  0x4b   :  { %648 = vmatpush3.bf16.msra.mxu0 %v729_v11  ;;  %668 = vmatpush3.bf16.msra.mxu1 %v738_v16 }
  0x4c   :  { %649 = vmatprep.subr.bf16.mxu0 %v848_v0  ;;  %669 = vmatprep.subr.bf16.mxu1 %v848_v0 }
  0x4f   :  { %650 = vmatpush3.bf16.msra.mxu0 %v730_v13  ;;  %670 = vmatpush3.bf16.msra.mxu1 %v739_v17 }
  0x50   :  { %675 = vmatprep.subr.bf16.mxu0 %v848_v0  ;;  %695 = vmatprep.subr.bf16.mxu1 %v848_v0 }
  0x52   :  { %652 = vmatmul.mubr.bf16.vlgmr.msra.gmra.mxu0 %v731_v14 }
  0x53   :  { %691 = vmatprep.mubr.msk.bf16.mxu0 %vm849_vm0, %v848_v0  ;;  %676 = vmatpush3.bf16.msra.mxu0 %v740_v18 }
  0x54   :  { %677 = vmatprep.subr.bf16.mxu0 %v848_v0 }
  0x57   :  { %678 = vmatpush3.bf16.msra.mxu0 %v741_v19 }
  0x58   :  { %679 = vmatprep.subr.bf16.mxu0 %v848_v0 }
  0x5b   :  { %680 = vmatpush3.bf16.msra.mxu0 %v742_v20 }
  0x5c   :  { %681 = vmatprep.subr.bf16.mxu0 %v848_v0 }
  0x5f   :  { %682 = vmatpush3.bf16.msra.mxu0 %v743_v21 }
  0x60   :  { %683 = vmatprep.subr.bf16.mxu0 %v848_v0 }
  0x63   :  { %684 = vmatpush3.bf16.msra.mxu0 %v744_v22 }
  0x64   :  { %685 = vmatprep.subr.bf16.mxu0 %v848_v0 }
  0x67   :  { %686 = vmatpush3.bf16.msra.mxu0 %v745_v33 }
  0x68   :  { %687 = vmatprep.subr.bf16.mxu0 %v848_v0 }
  0x6b   :  { %688 = vmatpush3.bf16.msra.mxu0 %v746_v34 }
  0x6c   :  { %689 = vmatprep.subr.bf16.mxu0 %v848_v0 }
  0x6f   :  { %690 = vmatpush3.bf16.msra.mxu0 %v747_v35 }
 0x112   :  { %v201_v24 = vpop.f32.mrf.mxu0 }
 0x113   :  { %v202_v26 = vadd.f32 %v562_v23, %v201_v24 }
 0x114   :  { %v653_v25 = vpop.f32.mrf.mxu0 }
 0x115   :  { %v208_v30 = vmax.f32 %v202_v26, 0.0 }
 0x116   :  { %v204_v27 = vpop.f32.mrf.mxu0 }
 0x117   :  { %v205_v28 = vadd.f32 %v562_v23, %v204_v27 }
 0x118   :  { %v654_v29 = vpop.f32.mrf.mxu0 }
 0x119   :  { %v209_v31 = vmax.f32 %v205_v28, 0.0 }
 0x11b   :  { %v210_v32 = vpack.c.bf16 %v209_v31, %v208_v30 }
 0x11d   :  { %672 = vmatmul.mubr.bf16.vlgmr.msra.gmra.mxu1 %v210_v32 }
 0x11e   :  { %711 = vmatprep.mubr.msk.bf16.mxu1 %vm849_vm0, %v848_v0  ;;  %696 = vmatpush3.bf16.msra.mxu1 %v748_v36 }
 0x11f   :  { %697 = vmatprep.subr.bf16.mxu1 %v848_v0 }
 0x122   :  { %698 = vmatpush3.bf16.msra.mxu1 %v749_v37 }
 0x123   :  { %699 = vmatprep.subr.bf16.mxu1 %v848_v0 }
 0x126   :  { %700 = vmatpush3.bf16.msra.mxu1 %v750_v38 }
 0x127   :  { %701 = vmatprep.subr.bf16.mxu1 %v848_v0 }
 0x12a   :  { %702 = vmatpush3.bf16.msra.mxu1 %v751_v39 }
 0x12b   :  { %703 = vmatprep.subr.bf16.mxu1 %v848_v0 }
 0x12e   :  { %704 = vmatpush3.bf16.msra.mxu1 %v752_v40 }
 0x12f   :  { %705 = vmatprep.subr.bf16.mxu1 %v848_v0 }
 0x132   :  { %706 = vmatpush3.bf16.msra.mxu1 %v753_v51 }
 0x133   :  { %707 = vmatprep.subr.bf16.mxu1 %v848_v0 }
 0x136   :  { %708 = vmatpush3.bf16.msra.mxu1 %v754_v52 }
 0x137   :  { %709 = vmatprep.subr.bf16.mxu1 %v848_v0  ;;  %v590_v0 = vld [vmem:[%s993_s8] ss:$0 sm:$0xff] }
 0x13a   :  { %710 = vmatpush3.bf16.msra.mxu1 %v755_v53 }
 0x1dd   :  { %v316_v42 = vpop.f32.mrf.mxu1 }
 0x1de   :  { %v317_v44 = vadd.f32 %v572_v41, %v316_v42 }
 0x1df   :  { %v673_v43 = vpop.f32.mrf.mxu1 }
 0x1e0   :  { %v323_v48 = vmax.f32 %v317_v44, 0.0 }
 0x1e1   :  { %v319_v45 = vpop.f32.mrf.mxu1 }
 0x1e2   :  { %v320_v46 = vadd.f32 %v572_v41, %v319_v45 }
 0x1e3   :  { %v674_v47 = vpop.f32.mrf.mxu1 }
 0x1e4   :  { %v324_v49 = vmax.f32 %v320_v46, 0.0 }
 0x1e6   :  { %v325_v50 = vpack.c.bf16 %v324_v49, %v323_v48 }
 0x1e8   :  { %692 = vmatmul.mubr.bf16.vlgmr.msra.gmra.mxu0 %v325_v50 }
 0x2a8   :  { %v431_v55 = vpop.f32.mrf.mxu0 }
 0x2a9   :  { %v432_v57 = vadd.f32 %v581_v54, %v431_v55 }
 0x2aa   :  { %v693_v56 = vpop.f32.mrf.mxu0 }
 0x2ab   :  { %v438_v61 = vmax.f32 %v432_v57, 0.0 }
 0x2ac   :  { %v434_v58 = vpop.f32.mrf.mxu0 }
 0x2ad   :  { %v435_v59 = vadd.f32 %v581_v54, %v434_v58 }
 0x2ae   :  { %v694_v60 = vpop.f32.mrf.mxu0 }
 0x2af   :  { %v439_v62 = vmax.f32 %v435_v59, 0.0 }
 0x2b1   :  { %v440_v63 = vpack.c.bf16 %v439_v62, %v438_v61 }
 0x2b3   :  { %712 = vmatmul.mubr.bf16.vlgmr.msra.gmra.mxu1 %v440_v63 }
 0x373   :  { %v546_v1 = vpop.f32.mrf.mxu1 }
 0x374   :  { %v547_v2 = vadd.f32 %v590_v0, %v546_v1 }
 0x375   :  { %v713_v3 = vpop.f32.mrf.mxu1 }
 0x376   :  { %553 = vst [vmem:[%s994_s9] sm:$0xff] %v547_v2 }
 0x377   :  { %v549_v4 = vpop.f32.mrf.mxu1 }
 0x378   :  { %v550_v5 = vadd.f32 %v590_v0, %v549_v4 }
 0x379   :  { %v714_v6 = vpop.f32.mrf.mxu1 }
 0x37a   :  { %554 = vst [vmem:[%s994_s9 + $0x8] sm:$0xff] %v550_v5 }
 0x37b   :  { %559 = vsyncpa [#allocation3], 1 }
 0x37c   :  { %560 = vsyncpa [#allocation5], 1 }
 0x37d   :  { %561 = vsyncpa [#allocation8], 1 }

</bundles_post_ra>
